<compile_context>
chip_gen: v6e
topology: v6e:2x2x1
jax: 0.10.0
libtpu: 0.0.40
codegen_flags: <defaults>
</compile_context>

<pallas_src>
import functools

import jax
import jax.numpy as jnp
from jax import lax
from jax.experimental import pallas as pl
from jax.experimental.pallas import tpu as pltpu

_LANES = 128


def _cdiv(a, b):
    return -(-a // b)


def _foo_kernel(x_ref, w1_ref, w2_ref, w3_ref, w4_ref, tail_ref,
                out_ref, acc_ref, *, block_rows, full_rows, bpc):
    c = pl.program_id(0)   # outer "core" axis (parallel; 2-way on v7x)
    i = pl.program_id(1)   # row-block index within this core's range

    @pl.when(i == 0)
    def _init():
        acc_ref[...] = jnp.zeros_like(acc_ref)

    # Logical row offset of this block (unclamped; the DMA block index is
    # clamped in the index_map, duplicates are fully masked out here).
    row0 = (c * bpc + i) * block_rows
    full_block = row0 + block_rows <= full_rows

    @pl.when(full_block)
    def _accum_full():
        # Steady state: just vld + vadd, trivially hidden under the DMA.
        acc_ref[...] += jnp.sum(x_ref[...], axis=0, keepdims=True)

    @pl.when(jnp.logical_not(full_block))
    def _accum_masked():
        # Boundary / duplicate block: mask rows past the valid row count
        # (VMEM past the clamped DMA is stale garbage -> must be zeroed).
        rows = lax.broadcasted_iota(jnp.int32, (block_rows, _LANES), 0) + row0
        xb = jnp.where(rows < full_rows, x_ref[...], 0.0)
        acc_ref[...] += jnp.sum(xb, axis=0, keepdims=True)

    @pl.when(i == pl.num_programs(1) - 1)
    def _finalize():
        # Weight term from 31 SMEM scalars (scalar unit only, no MXU):
        #   wterm = (w1 @ w3)[0,0] + w2[0,0] * sum(w4)
        w13 = w1_ref[0] * w3_ref[0]
        sw4 = w4_ref[0]
        for k in range(1, 10):
            w13 = w13 + w1_ref[k] * w3_ref[k]
            sw4 = sw4 + w4_ref[k]
        wterm = w13 + w2_ref[0] * sw4
        # Reduce first, then scale (no vector broadcast of the scalar).
        s = jnp.sum(acc_ref[...])
        s = s + jnp.where(c == 0, tail_ref[0], 0.0)   # ragged tail counted once
        out_ref[...] = jnp.full((1, 8, _LANES), s * wterm, jnp.float32)


def foo_forward(x, w1, w2, w3, w4, *, max_block_rows=4096):
    # x: (..., 1) float32 (PyTorch module input layout); out = sum over all of x
    # times the weight term, identical to t3.sum() + t4.sum().
    xf = x.reshape(-1).astype(jnp.float32)
    n = xf.shape[0]
    full_rows = n // _LANES
    rem = n - full_rows * _LANES

    if full_rows == 0:
        # Tiny input: dummy slab (fully masked in-kernel); tail covers all of x.
        x2d = jnp.zeros((8, _LANES), jnp.float32)
        arr_rows = 8
    elif rem == 0:
        # Zero-copy bitcast reshape: no padded copy of x.
        x2d = xf.reshape(full_rows, _LANES)
        arr_rows = full_rows
    else:
        # Divisible prefix only; the <128-element tail is folded in separately.
        x2d = xf[: full_rows * _LANES].reshape(full_rows, _LANES)
        arr_rows = full_rows

    if rem:
        tail_sum = jnp.sum(xf[full_rows * _LANES:]).reshape(1)
    else:
        tail_sum = jnp.zeros((1,), jnp.float32)

    # 2 MiB blocks (4096 rows x 128 lanes x f32); full-array block if smaller.
    block_rows = arr_rows if arr_rows < max_block_rows else max_block_rows
    nblk = _cdiv(arr_rows, block_rows)
    bpc = _cdiv(nblk, 2)          # row blocks per core (outer axis of size 2)
    grid = (2, bpc)

    def x_index_map(c, i):
        # Clamp so a core with fewer real blocks re-reads the last block;
        # its contribution is fully masked in-kernel (row0 >= full_rows).
        return (jnp.minimum(c * bpc + i, nblk - 1), 0)

    smem = pl.BlockSpec(memory_space=pltpu.MemorySpace.SMEM)
    kernel = functools.partial(_foo_kernel, block_rows=block_rows,
                               full_rows=full_rows, bpc=bpc)

    out = pl.pallas_call(
        kernel,
        out_shape=jax.ShapeDtypeStruct((2, 8, _LANES), jnp.float32),
        grid=grid,
        in_specs=[
            pl.BlockSpec((block_rows, _LANES), x_index_map),  # x tile in VMEM
            smem,  # w1 (10,)
            smem,  # w2 (1,)
            smem,  # w3 (10,)
            smem,  # w4 (10,)
            smem,  # tail_sum (1,)
        ],
        out_specs=pl.BlockSpec((1, 8, _LANES), lambda c, i: (c, 0, 0)),
        scratch_shapes=[pltpu.VMEM((1, _LANES), jnp.float32)],
        compiler_params=pltpu.CompilerParams(
            # Outer axis shards row blocks across TensorCores (v7x); inner axis
            # carries the resident accumulator -> must stay "arbitrary".
            dimension_semantics=("parallel", "arbitrary"),
        ),
    )(x2d,
      w1.reshape(-1).astype(jnp.float32),
      w2.reshape(-1).astype(jnp.float32),
      w3.reshape(-1).astype(jnp.float32),
      w4.reshape(-1).astype(jnp.float32),
      tail_sum)

    # Combine the two per-core partial results.
    return out[0, 0, 0] + out[1, 0, 0]


if __name__ == "__main__":
    key = jax.random.PRNGKey(0)
    N = 1000  # not a multiple of 128 -> exercises zero-copy prefix + tail path

    x = jax.random.normal(key, (N, 1), dtype=jnp.float32)

    # Deterministic parameters, exactly as in Foo.__init__ (torch.ones).
    w1 = jnp.ones((1, 10), jnp.float32)
    w2 = jnp.ones((1, 1), jnp.float32)
    w3 = jnp.ones((10, 1), jnp.float32)
    w4 = jnp.ones((1, 10), jnp.float32)

    out = foo_forward(x, w1, w2, w3, w4)
    out = jax.block_until_ready(out)

    # Pure-JAX reference (original op-by-op semantics). Tolerance accounts for
    # the intentional FP reassociation of the collapsed form.
    t1 = x @ w1
    t2 = x @ w2
    t3 = t1 @ w3
    t4 = t2 @ w4
    ref = t3.sum() + t4.sum()
    assert jnp.allclose(out, ref, rtol=1e-4, atol=1e-3), (out, ref)

    print("KERNEL_OK")
</pallas_src>

<mosaic_0001>
module attributes {stable_mosaic.version = 11 : i64} {
  func.func @_foo_kernel(%arg0: i32, %arg1: i32, %arg2: memref<7x128xf32, #tpu.memory_space<vmem>>, %arg3: memref<10xf32, #tpu.memory_space<smem>>, %arg4: memref<1xf32, #tpu.memory_space<smem>>, %arg5: memref<10xf32, #tpu.memory_space<smem>>, %arg6: memref<10xf32, #tpu.memory_space<smem>>, %arg7: memref<1xf32, #tpu.memory_space<smem>>, %arg8: memref<1x8x128xf32, #tpu.memory_space<vmem>>, %arg9: memref<1x128xf32, #tpu.memory_space<vmem>>) attributes {dimension_semantics = [#tpu.dimension_semantics<parallel>, #tpu.dimension_semantics<arbitrary>], iteration_bounds = array<i64: 2, 1>, scalar_prefetch = 0 : i64, scratch_operands = 1 : i64, tpu.core_type = #tpu.core_type<tc>, window_params = [{transform_indices = @transform_0, window_bounds = array<i64: 7, 128>}, {transform_indices = @transform_1, window_bounds = array<i64: 10>}, {transform_indices = @transform_2, window_bounds = array<i64: 1>}, {transform_indices = @transform_3, window_bounds = array<i64: 10>}, {transform_indices = @transform_4, window_bounds = array<i64: 10>}, {transform_indices = @transform_5, window_bounds = array<i64: 1>}, {transform_indices = @transform_6, window_bounds = array<i64: 1, 8, 128>}]} {
    %c0_i32 = arith.constant 0 : i32
    %0 = arith.cmpi eq, %arg1, %c0_i32 : i32
    %1 = arith.extui %0 : i1 to i32
    %c0_i32_0 = arith.constant 0 : i32
    %2 = arith.cmpi ne, %1, %c0_i32_0 : i32
    scf.if %2 {
      %cst = arith.constant 0.000000e+00 : f32
      %16 = vector.broadcast %cst : f32 to vector<1x128xf32>
      %c0 = arith.constant 0 : index
      %c0_7 = arith.constant 0 : index
      %17 = vector.load %arg9[%c0, %c0_7] : memref<1x128xf32, #tpu.memory_space<vmem>>, vector<1x128xf32>
      tpu.vector_store %arg9[%c0, %c0_7], %16 {strides = array<i32>} : memref<1x128xf32, #tpu.memory_space<vmem>>, vector<1x128xf32>,
    } else {
    }
    %c1_i32 = arith.constant 1 : i32
    %3 = arith.muli %arg0, %c1_i32 : i32
    %4 = arith.addi %3, %arg1 : i32
    %c7_i32 = arith.constant 7 : i32
    %5 = arith.muli %4, %c7_i32 : i32
    %c7_i32_1 = arith.constant 7 : i32
    %6 = arith.addi %5, %c7_i32_1 : i32
    %c7_i32_2 = arith.constant 7 : i32
    %7 = arith.cmpi sle, %6, %c7_i32_2 : i32
    %8 = arith.extui %7 : i1 to i32
    %c0_i32_3 = arith.constant 0 : i32
    %9 = arith.cmpi ne, %8, %c0_i32_3 : i32
    scf.if %9 {
      %c0 = arith.constant 0 : index
      %c0_7 = arith.constant 0 : index
      %16 = vector.load %arg9[%c0, %c0_7] : memref<1x128xf32, #tpu.memory_space<vmem>>, vector<1x128xf32>
      %c0_8 = arith.constant 0 : index
      %c0_9 = arith.constant 0 : index
      %17 = vector.load %arg2[%c0_8, %c0_9] : memref<7x128xf32, #tpu.memory_space<vmem>>, vector<7x128xf32>
      %cst = arith.constant dense<0.000000e+00> : vector<128xf32>
      %18 = vector.multi_reduction <add>, %17, %cst [0] : vector<7x128xf32> to vector<128xf32>
      %19 = vector.shape_cast %18 : vector<128xf32> to vector<1x128xf32>
      %20 = arith.addf %16, %19 : vector<1x128xf32>
      %c0_10 = arith.constant 0 : index
      %c0_11 = arith.constant 0 : index
      %21 = vector.load %arg9[%c0_10, %c0_11] : memref<1x128xf32, #tpu.memory_space<vmem>>, vector<1x128xf32>
      tpu.vector_store %arg9[%c0_10, %c0_11], %20 {strides = array<i32>} : memref<1x128xf32, #tpu.memory_space<vmem>>, vector<1x128xf32>,
    } else {
    }
    %true = arith.constant true
    %10 = arith.xori %7, %true : i1
    %11 = arith.extui %10 : i1 to i32
    %c0_i32_4 = arith.constant 0 : i32
    %12 = arith.cmpi ne, %11, %c0_i32_4 : i32
    scf.if %12 {
      %16 = tpu.iota {dimensions = array<i32: 0>} : vector<7x128xi32>
      %17 = vector.broadcast %5 : i32 to vector<7x128xi32>
      %18 = arith.addi %16, %17 : vector<7x128xi32>
      %c7_i32_7 = arith.constant 7 : i32
      %19 = vector.broadcast %c7_i32_7 : i32 to vector<7x128xi32>
      %20 = arith.cmpi slt, %18, %19 : vector<7x128xi32>
      %c0 = arith.constant 0 : index
      %c0_8 = arith.constant 0 : index
      %21 = vector.load %arg2[%c0, %c0_8] : memref<7x128xf32, #tpu.memory_space<vmem>>, vector<7x128xf32>
      %cst = arith.constant 0.000000e+00 : f32
      %22 = vector.broadcast %cst : f32 to vector<7x128xf32>
      %23 = arith.select %20, %21, %22 : vector<7x128xi1>, vector<7x128xf32>
      %c0_9 = arith.constant 0 : index
      %c0_10 = arith.constant 0 : index
      %24 = vector.load %arg9[%c0_9, %c0_10] : memref<1x128xf32, #tpu.memory_space<vmem>>, vector<1x128xf32>
      %cst_11 = arith.constant dense<0.000000e+00> : vector<128xf32>
      %25 = vector.multi_reduction <add>, %23, %cst_11 [0] : vector<7x128xf32> to vector<128xf32>
      %26 = vector.shape_cast %25 : vector<128xf32> to vector<1x128xf32>
      %27 = arith.addf %24, %26 : vector<1x128xf32>
      %c0_12 = arith.constant 0 : index
      %c0_13 = arith.constant 0 : index
      %28 = vector.load %arg9[%c0_12, %c0_13] : memref<1x128xf32, #tpu.memory_space<vmem>>, vector<1x128xf32>
      tpu.vector_store %arg9[%c0_12, %c0_13], %27 {strides = array<i32>} : memref<1x128xf32, #tpu.memory_space<vmem>>, vector<1x128xf32>,
    } else {
    }
    %c0_i32_5 = arith.constant 0 : i32
    %13 = arith.cmpi eq, %arg1, %c0_i32_5 : i32
    %14 = arith.extui %13 : i1 to i32
    %c0_i32_6 = arith.constant 0 : i32
    %15 = arith.cmpi ne, %14, %c0_i32_6 : i32
    scf.if %15 {
      %c0 = arith.constant 0 : index
      %16 = memref.load %arg3[%c0] : memref<10xf32, #tpu.memory_space<smem>>
      %c0_7 = arith.constant 0 : index
      %17 = memref.load %arg5[%c0_7] : memref<10xf32, #tpu.memory_space<smem>>
      %18 = arith.mulf %16, %17 : f32
      %c0_8 = arith.constant 0 : index
      %19 = memref.load %arg6[%c0_8] : memref<10xf32, #tpu.memory_space<smem>>
      %c1 = arith.constant 1 : index
      %20 = memref.load %arg3[%c1] : memref<10xf32, #tpu.memory_space<smem>>
      %c1_9 = arith.constant 1 : index
      %21 = memref.load %arg5[%c1_9] : memref<10xf32, #tpu.memory_space<smem>>
      %22 = arith.mulf %20, %21 : f32
      %23 = arith.addf %18, %22 : f32
      %c1_10 = arith.constant 1 : index
      %24 = memref.load %arg6[%c1_10] : memref<10xf32, #tpu.memory_space<smem>>
      %25 = arith.addf %19, %24 : f32
      %c2 = arith.constant 2 : index
      %26 = memref.load %arg3[%c2] : memref<10xf32, #tpu.memory_space<smem>>
      %c2_11 = arith.constant 2 : index
      %27 = memref.load %arg5[%c2_11] : memref<10xf32, #tpu.memory_space<smem>>
      %28 = arith.mulf %26, %27 : f32
      %29 = arith.addf %23, %28 : f32
      %c2_12 = arith.constant 2 : index
      %30 = memref.load %arg6[%c2_12] : memref<10xf32, #tpu.memory_space<smem>>
      %31 = arith.addf %25, %30 : f32
      %c3 = arith.constant 3 : index
      %32 = memref.load %arg3[%c3] : memref<10xf32, #tpu.memory_space<smem>>
      %c3_13 = arith.constant 3 : index
      %33 = memref.load %arg5[%c3_13] : memref<10xf32, #tpu.memory_space<smem>>
      %34 = arith.mulf %32, %33 : f32
      %35 = arith.addf %29, %34 : f32
      %c3_14 = arith.constant 3 : index
      %36 = memref.load %arg6[%c3_14] : memref<10xf32, #tpu.memory_space<smem>>
      %37 = arith.addf %31, %36 : f32
      %c4 = arith.constant 4 : index
      %38 = memref.load %arg3[%c4] : memref<10xf32, #tpu.memory_space<smem>>
      %c4_15 = arith.constant 4 : index
      %39 = memref.load %arg5[%c4_15] : memref<10xf32, #tpu.memory_space<smem>>
      %40 = arith.mulf %38, %39 : f32
      %41 = arith.addf %35, %40 : f32
      %c4_16 = arith.constant 4 : index
      %42 = memref.load %arg6[%c4_16] : memref<10xf32, #tpu.memory_space<smem>>
      %43 = arith.addf %37, %42 : f32
      %c5 = arith.constant 5 : index
      %44 = memref.load %arg3[%c5] : memref<10xf32, #tpu.memory_space<smem>>
      %c5_17 = arith.constant 5 : index
      %45 = memref.load %arg5[%c5_17] : memref<10xf32, #tpu.memory_space<smem>>
      %46 = arith.mulf %44, %45 : f32
      %47 = arith.addf %41, %46 : f32
      %c5_18 = arith.constant 5 : index
      %48 = memref.load %arg6[%c5_18] : memref<10xf32, #tpu.memory_space<smem>>
      %49 = arith.addf %43, %48 : f32
      %c6 = arith.constant 6 : index
      %50 = memref.load %arg3[%c6] : memref<10xf32, #tpu.memory_space<smem>>
      %c6_19 = arith.constant 6 : index
      %51 = memref.load %arg5[%c6_19] : memref<10xf32, #tpu.memory_space<smem>>
      %52 = arith.mulf %50, %51 : f32
      %53 = arith.addf %47, %52 : f32
      %c6_20 = arith.constant 6 : index
      %54 = memref.load %arg6[%c6_20] : memref<10xf32, #tpu.memory_space<smem>>
      %55 = arith.addf %49, %54 : f32
      %c7 = arith.constant 7 : index
      %56 = memref.load %arg3[%c7] : memref<10xf32, #tpu.memory_space<smem>>
      %c7_21 = arith.constant 7 : index
      %57 = memref.load %arg5[%c7_21] : memref<10xf32, #tpu.memory_space<smem>>
      %58 = arith.mulf %56, %57 : f32
      %59 = arith.addf %53, %58 : f32
      %c7_22 = arith.constant 7 : index
      %60 = memref.load %arg6[%c7_22] : memref<10xf32, #tpu.memory_space<smem>>
      %61 = arith.addf %55, %60 : f32
      %c8 = arith.constant 8 : index
      %62 = memref.load %arg3[%c8] : memref<10xf32, #tpu.memory_space<smem>>
      %c8_23 = arith.constant 8 : index
      %63 = memref.load %arg5[%c8_23] : memref<10xf32, #tpu.memory_space<smem>>
      %64 = arith.mulf %62, %63 : f32
      %65 = arith.addf %59, %64 : f32
      %c8_24 = arith.constant 8 : index
      %66 = memref.load %arg6[%c8_24] : memref<10xf32, #tpu.memory_space<smem>>
      %67 = arith.addf %61, %66 : f32
      %c9 = arith.constant 9 : index
      %68 = memref.load %arg3[%c9] : memref<10xf32, #tpu.memory_space<smem>>
      %c9_25 = arith.constant 9 : index
      %69 = memref.load %arg5[%c9_25] : memref<10xf32, #tpu.memory_space<smem>>
      %70 = arith.mulf %68, %69 : f32
      %71 = arith.addf %65, %70 : f32
      %c9_26 = arith.constant 9 : index
      %72 = memref.load %arg6[%c9_26] : memref<10xf32, #tpu.memory_space<smem>>
      %73 = arith.addf %67, %72 : f32
      %c0_27 = arith.constant 0 : index
      %74 = memref.load %arg4[%c0_27] : memref<1xf32, #tpu.memory_space<smem>>
      %75 = arith.mulf %74, %73 : f32
      %76 = arith.addf %71, %75 : f32
      %c0_28 = arith.constant 0 : index
      %c0_29 = arith.constant 0 : index
      %77 = vector.load %arg9[%c0_28, %c0_29] : memref<1x128xf32, #tpu.memory_space<vmem>>, vector<1x128xf32>
      %78 = vector.shape_cast %77 : vector<1x128xf32> to vector<1x1x128xf32>
      %cst = arith.constant dense<0.000000e+00> : vector<1xf32>
      %79 = vector.multi_reduction <add>, %78, %cst [1, 2] : vector<1x1x128xf32> to vector<1xf32>
      %80 = vector.shape_cast %79 : vector<1xf32> to vector<1x1x1xf32>
      %81 = vector.extract %80[0, 0, 0] : f32 from vector<1x1x1xf32>
      %c0_i32_30 = arith.constant 0 : i32
      %82 = arith.cmpi eq, %arg0, %c0_i32_30 : i32
      %c0_31 = arith.constant 0 : index
      %83 = memref.load %arg7[%c0_31] : memref<1xf32, #tpu.memory_space<smem>>
      %cst_32 = arith.constant 0.000000e+00 : f32
      %84 = arith.select %82, %83, %cst_32 : f32
      %85 = arith.addf %81, %84 : f32
      %86 = arith.mulf %85, %76 : f32
      %87 = vector.broadcast %86 : f32 to vector<1x8x128xf32>
      %c0_33 = arith.constant 0 : index
      %c0_34 = arith.constant 0 : index
      %c0_35 = arith.constant 0 : index
      %88 = vector.load %arg8[%c0_33, %c0_34, %c0_35] : memref<1x8x128xf32, #tpu.memory_space<vmem>>, vector<1x8x128xf32>
      tpu.vector_store %arg8[%c0_33, %c0_34, %c0_35], %87 {strides = array<i32>} : memref<1x8x128xf32, #tpu.memory_space<vmem>>, vector<1x8x128xf32>,
    } else {
    }
    return
  }
  func.func @transform_0(%arg0: i32, %arg1: i32) -> (i32, i32) {
    %c1_i32 = arith.constant 1 : i32
    %0 = arith.muli %arg0, %c1_i32 : i32
    %1 = arith.addi %0, %arg1 : i32
    %c0_i32 = arith.constant 0 : i32
    %2 = arith.minsi %1, %c0_i32 : i32
    %c0_i32_0 = arith.constant 0 : i32
    %c0_i32_1 = arith.constant 0 : i32
    return %2, %c0_i32_0 : i32, i32
  }
  func.func @transform_1(%arg0: i32, %arg1: i32) -> i32 {
    %c0_i32 = arith.constant 0 : i32
    %c0_i32_0 = arith.constant 0 : i32
    return %c0_i32 : i32
  }
  func.func @transform_2(%arg0: i32, %arg1: i32) -> i32 {
    %c0_i32 = arith.constant 0 : i32
    %c0_i32_0 = arith.constant 0 : i32
    return %c0_i32 : i32
  }
  func.func @transform_3(%arg0: i32, %arg1: i32) -> i32 {
    %c0_i32 = arith.constant 0 : i32
    %c0_i32_0 = arith.constant 0 : i32
    return %c0_i32 : i32
  }
  func.func @transform_4(%arg0: i32, %arg1: i32) -> i32 {
    %c0_i32 = arith.constant 0 : i32
    %c0_i32_0 = arith.constant 0 : i32
    return %c0_i32 : i32
  }
  func.func @transform_5(%arg0: i32, %arg1: i32) -> i32 {
    %c0_i32 = arith.constant 0 : i32
    %c0_i32_0 = arith.constant 0 : i32
    return %c0_i32 : i32
  }
  func.func @transform_6(%arg0: i32, %arg1: i32) -> (i32, i32, i32) {
    %c0_i32 = arith.constant 0 : i32
    %c0_i32_0 = arith.constant 0 : i32
    %c0_i32_1 = arith.constant 0 : i32
    return %arg0, %c0_i32, %c0_i32_0 : i32, i32, i32
  }
}

</mosaic_0001>

<bundles_post_ra>
// kernel: tpu_custom_call.1
= control target key start
LH: loop header
LB: loop body
LE: loop exit
PB: predicated region body
PF: predicated region fallthrough
CT: control target
= control target key end

     0   :  { %s1202_s0 = inlined_call_operand.hbm [shape: f32[7,128], index: 0, kind: input, shape index: {}]   ;;  %s1203_s1 = inlined_call_operand.vmem [shape: f32[10], index: 1, kind: input, shape index: {}]   ;;  %s1204_s2 = inlined_call_operand.<no memory space> [shape: f32[1], index: 2, kind: input, shape index: {}]   ;;  %s1205_s3 = inlined_call_operand.vmem [shape: f32[10], index: 3, kind: input, shape index: {}]   ;;  %s1206_s4 = inlined_call_operand.vmem [shape: f32[10], index: 4, kind: input, shape index: {}]   ;;  %s1207_s5 = inlined_call_operand.<no memory space> [shape: f32[1], index: 5, kind: input, shape index: {}]   ;;  %s1208_s6 = inlined_call_operand.hbm [shape: f32[2,8,128], index: 6, kind: output, shape index: {}]  }
   0x1   :  { %1227 = sst [smem:[#allocation28_spill]] %s1202_s0 }
   0x2   :  { %1228 = sst [smem:[#allocation29_spill]] %s1203_s1 }
   0x3   :  { %1229 = sst [smem:[#allocation30_spill]] %s1205_s3 }
   0x4   :  { %1230 = sst [smem:[#allocation31_spill]] %s1206_s4 }
   0x5   :  { %1231 = sst [smem:[#allocation32_spill]] %s1208_s6 }
   0x6   :  { %11 = sst [smem:[#allocation3]] %s1204_s2 }
   0x7   :  { %12 = sst [smem:[#allocation4]] %s1207_s5 }
   0x8   :  { %13 = vsyncpa [#allocation6], 0 }
   0x9   :  { %15 = vsyncpa [#allocation6 + $0x1], 0 }
   0xa   :  { %16 = vsyncpa [#allocation8], 0 }
   0xb   :  { %17 = vsyncpa [#allocation11], 0 }
   0xc   :  { %18 = vsyncpa [#allocation7], 0 }
   0xd   :  { %20 = vsyncpa [#allocation7 + $0x1], 0  ;;  %s983_s25 = smov 0   ;;  %s985_s26 = smov 0  }
   0xe   :  { %s987_s27 = smov 0   ;;  %s989_s28 = smov 0  }
   0xf   :  { %s991_s29 = smov 0   ;;  %s993_s2 = smov 0  }
  0x10   :  { %s995_s30 = smov 0   ;;  %s997_s5 = smov 0  }
  0x11 LB: > { %1232 = sst [smem:[#allocation18_spill]] %s906_s25  ;;  %s584_s7 = sadd.s32 4294967295, %s934_s5   ;;  %s934_s5 = sphi %s997_s5, %s26_s5   ;;  %s930_s30 = sphi %s995_s30, %s1273_s30   ;;  %s926_s2 = sphi %s993_s2, %s1272_s2   ;;  %s922_s29 = sphi %s991_s29, %s1192_s29   ;;  %s918_s28 = sphi %s989_s28, %s1271_s28   ;;  %s914_s27 = sphi %s987_s27, %s1270_s27   ;;  %s910_s26 = sphi %s985_s26, %s1269_s26   ;;  %s906_s25 = sphi %s983_s25, %s1268_s25  }
  0x12   : > { %1233 = sst [smem:[#allocation19_spill]] %s910_s26  ;;  %s585_s8 = sadd.s32 4294967294, %s934_s5  }
  0x13   : > { %1234 = sst [smem:[#allocation20_spill]] %s914_s27  ;;  %p64_p0 = scmp.ne.s32.totalorder %s922_s29, %s918_s28 }
  0x14   : > { %1235 = sst [smem:[#allocation21_spill]] %s922_s29  ;;  %p1024_p1 = scmp.eq.s32.totalorder %s584_s7, 0 }
  0x15   : > { %1236 = sst [smem:[#allocation22_spill]] %s930_s30  ;;  %p192_p2 = scmp.ne.s32.totalorder %s914_s27, %s910_s26 }
  0x16   : > { %1237 = sst [smem:[#allocation23_spill]] %s934_s5  ;;  %p193_p3 = scmp.eq.s32.totalorder %s584_s7, 1 }
  0x17   : > { %s1238_s9 = scalar_select %p1024_p1, 1, 0 }
  0x18   : > { %p1032_p4 = por %p1024_p1, %p64_p0  ;;  %p198_p5 = scmp.ne.s32.totalorder %s910_s26, %s906_s25 }
  0x19   : > { %p1038_p6 = por %p193_p3, %p192_p2  ;;  %p199_p7 = scmp.eq.s32.totalorder %s585_s8, 1 }
  0x1a   : > { %s1239_s10 = scalar_select %p1032_p4, 1, 0 }
  0x1b   : > { %s1240_s11 = scalar_select %p1038_p6, 1, 0 }
  0x1c   : > { %p586_p8 = scmp.ge.s32.totalorder %s934_s5, 1  ;;  %p206_p9 = scmp.lt.s32.totalorder %s934_s5, 3 }
  0x1d   : > { %1241 = sst [smem:[#allocation24_spill]] %s1240_s11  ;;  %p1044_p10 = por %p199_p7, %p198_p5 }
  0x1e   : > { %p1048_p11 = pnand %p586_p8, %p206_p9  ;;  %s1245_s3 = sld [smem:[#allocation30_spill]] }
  0x1f   : > { %s1242_s12 = scalar_select %p1044_p10, 1, 0 }
  0x20   : > { %s1244_s13 = scalar_select %p1048_p11, 1, 0 }
  0x21   : > { %1243 = sst [smem:[#allocation25_spill]] %s1242_s12  ;;  %p650_p12 = pneg %p1048_p11 }
  0x22   : > { %s1246_s1 = sld [smem:[#allocation29_spill]] }
  0x23   : > { %p1063_p0 = pnand %p650_p12, %p1024_p1  ;;  %s1248_s4 = sld [smem:[#allocation31_spill]] }
  0x24   : > { %s233_s16 = sshll.u32 %s1245_s3, 4  ;;  %s234_s16 = int_to_ptr.vmem [resolvable:$true] %s233_s16 }
  0x25   : > { %s752_s24 = scalar_lea.vmem %s234_s16, 16  ;;  %p754_p3 = pneg %p1063_p0 }
  0x26   : > { %p753_p2 = scmp.ne.s32.totalorder %s234_s16, %s752_s24  ;;  %p760_p8 = scmp.lt.s32.totalorder %s234_s16, %s234_s16 }
  0x27   : > { %p761_p9 = scmp.lt.s32.totalorder %s752_s24, %s752_s24 }
  0x28   : > { %s219_s19 = sshll.u32 %s1246_s1, 4  ;;  %p755_p5 = pnand %p754_p3, %p753_p2  ;;  %s220_s19 = int_to_ptr.vmem [resolvable:$true] %s219_s19 }
  0x29   : > { %s244_s23 = sshll.u32 %s1248_s4, 4  ;;  %p762_p12 = por %p761_p9, %p760_p8  ;;  %s245_s23 = int_to_ptr.vmem [resolvable:$true] %s244_s23 }
  0x2a   : > { %p756_p7 = pneg %p755_p5 }
  0x2c   : > { %p763_p13 = pnand %p762_p12, %p756_p7 }
  0x2e   : > { %766 = shalt.err (!%p763_p13)
}
  0x2f   : > { %s936_s28 = smov [#allocation10]   ;;  %s767_s7 = scalar_lea.vmem %s220_s19, 16 }
  0x30   : > { %656 = dma.vmem_to_smem (!%p1063_p0), %s234_s16, 16, %s936_s28, [#allocation11]  }
  0x31   : > { %p768_p10 = scmp.ne.s32.totalorder %s220_s19, %s767_s7  ;;  %p775_p4 = scmp.lt.s32.totalorder %s220_s19, %s220_s19 }
  0x32   : > { %p776_p11 = scmp.lt.s32.totalorder %s767_s7, %s767_s7 }
  0x33   : > { %p770_p6 = pnand %p768_p10, %p754_p3 }
  0x34   : > { %p777_p2 = por %p776_p11, %p775_p4 }
  0x35   : > { %p771_p1 = pneg %p770_p6 }
  0x37   : > { %p778_p5 = pnand %p777_p2, %p771_p1 }
  0x39   : > { %781 = shalt.err (!%p778_p5)
}
  0x3a   : > { %s937_s8 = smov [#allocation9]   ;;  %s782_s14 = scalar_lea.vmem %s245_s23, 16 }
  0x3b   : > { %653 = dma.vmem_to_smem (!%p1063_p0), %s220_s19, 16, %s937_s8, [#allocation8]  }
  0x3c   : > { %p783_p13 = scmp.ne.s32.totalorder %s245_s23, %s782_s14  ;;  %p790_p9 = scmp.lt.s32.totalorder %s245_s23, %s245_s23 }
  0x3d   : > { %p791_p10 = scmp.lt.s32.totalorder %s782_s14, %s782_s14 }
  0x3e   : > { %p785_p7 = pnand %p783_p13, %p754_p3 }
  0x3f   : > { %p792_p6 = por %p791_p10, %p790_p9 }
  0x40   : > { %p786_p8 = pneg %p785_p7 }
  0x42   : > { %p793_p12 = pnand %p792_p6, %p786_p8 }
  0x44   : > { %796 = shalt.err (!%p793_p12)
}
  0x45   : > { %s938_s15 = smov [#allocation12]   ;;  %s38_s16 = sadd.s32 1, %s930_s30 }
  0x46   : > { %659 = dma.vmem_to_smem (!%p1063_p0), %s245_s23, 16, %s938_s15, [#allocation11]  }
  0x47   : > { %p40_p1 = scmp.ge.s32.totalorder %s38_s16, 2  ;;  %p903_p4 = scmp.ne.s32.totalorder %s922_s29, 0 }
  0x48   : > { %p59_p11 = scmp.eq.s32.totalorder %s934_s5, 0  ;;  %s182_s18 = sadd.s32 1, %s914_s27 }
  0x49   : > { %s1275_s16 = smov (%p40_p1, %s38_s16), 0  ;;  %p671_p5 = scmp.lt.s32.totalorder %s934_s5, 2 }
  0x4a   : > { %1249 = sst [smem:[#allocation26_spill]] %s1275_s16  ;;  %s179_s17 = ssub.s32 %s930_s30, %s1275_s16 }
  0x4b   : > { %p60_p3 = por %p903_p4, %p59_p11  ;;  %p180_p2 = scmp.eq.s32.totalorder %s179_s17, 0 }
  0x4c   : > { %s939_s20 = smov [#allocation5]   ;;  %s1252_s0 = sld [smem:[#allocation28_spill]] }
  0x4d   : > { %s1097_s19 = scalar_select %p180_p2, %s914_s27, %s182_s18  }
  0x4e   : > { %s272_s21 = sshll.u32 %s939_s20, 4  ;;  %p1099_p13 = pnand %p671_p5, %p60_p3  ;;  %s273_s21 = int_to_ptr.vmem [resolvable:$true] %s272_s21 }
  0x4f   : > { %1250 = sst [smem:[#allocation27_spill]] %s1097_s19 }
  0x50   : > { %p799_p7 = pneg %p1099_p13 }
  0x52   : > { %s797_s28 = scalar_lea.hbm %s1252_s0, 128 }
  0x53   : > { %p798_p0 = scmp.ne.s32.totalorder %s1252_s0, %s797_s28  ;;  %p804_p10 = scmp.lt.s32.totalorder %s797_s28, %s797_s28 }
  0x55   : > { %p800_p8 = pnand %p799_p7, %p798_p0 }
  0x57   : > { %p801_p9 = pneg %p800_p8 }
  0x59   : > { %p806_p6 = pnand %p804_p10, %p801_p9 }
  0x5b   : > { %809 = shalt.err (!%p806_p6)
}
  0x5c   : > { %s810_s14 = scalar_lea.vmem %s273_s21, 128  ;;  %s817_s15 = scalar_lea.vmem %s273_s21, 256 }
  0x5d   : > { %p811_p12 = scmp.ne.s32.totalorder %s273_s21, %s810_s14  ;;  %p818_p11 = scmp.lt.s32.totalorder %s273_s21, %s273_s21 }
  0x5e   : > { %p819_p3 = scmp.lt.s32.totalorder %s817_s15, %s810_s14 }
  0x5f   : > { %p813_p1 = pnand %p811_p12, %p799_p7 }
  0x60   : > { %p820_p2 = por %p819_p3, %p818_p11 }
  0x61   : > { %p814_p4 = pneg %p813_p1 }
  0x63   : > { %p821_p5 = pnand %p820_p2, %p814_p4 }
  0x65   : > { %824 = shalt.err (!%p821_p5)
}
  0x66   : > { %663 = dma.hbm_to_vmem [thread:$0]  (!%p1099_p13), %s1252_s0, 128, %s273_s21, [#allocation6]  }
  0x67   : > { %p1253_p0 = scmp.ne.s32.totalorder %s1244_s13, 0 }
  0x68   : > { %s283_s20 = sand.u32 (!%p1253_p0), 1, %s922_s29   ;;  %p1254_p7 = scmp.ne.s32.totalorder (!%p1253_p0), %s1239_s10, 0 }
  0x69   : > { %281 = sbr.rel (%p1253_p0) target bundleno = 402 (0x192), region = 44  ;;  %s1119_s23 = sshll.u32 (!%p1253_p0), %s283_s20, 3 }
  0x6a   : > { %s284_s24 = scalar_lea.sflag (!%p1253_p0), [#allocation6], %s283_s20  ;;  %s287_s28 = scalar_lea.vmem (!%p1253_p0), [#allocation5], %s1119_s23 }
  0x6e   : > { %888 = dma.done.wait (%p1254_p7), %s284_s24, 128  }
  0x6f   : > { %890 = vsyncadd (%p1254_p7), %s284_s24, 4294967168  ;;  %p1255_p8 = scmp.ne.s32.totalorder %s1238_s9, 0 }
  0x71   : > { %892 = dma.done.wait (%p1255_p8), [#allocation8], 16  }
  0x72   : > { %894 = vsyncadd (%p1255_p8), [#allocation8], 4294967280 }
  0x73   : > { %896 = dma.done.wait (%p1255_p8), [#allocation11], 32  }
  0x74   : > { %898 = vsyncadd (%p1255_p8), [#allocation11], 4294967264 }
  0x75   : > { %304 = sfence }
  0x76   : > { %s1214_s13 = sand.u32 1, %s910_s26   ;;  %s338_s21 = smul.u32 7, %s926_s2  ;;  %v940_v0 = vmov 0.0  }
  0x77   : > { %s1138_s10 = sshll.u32 %s1214_s13, 3  ;;  %336 = vst [vmem:[#allocation2] sm:$0x1] %v940_v0 }
  0x78   : > { %s339_s22 = sadd.s32 7, %s338_s21 }
  0x79   : > { %p599_p13 = scmp.gt.s32.totalorder %s339_s22, 7 }
  0x7b   : > { %343 = sbr.rel (%p599_p13) target bundleno = 145 (0x91), region = 68 }
  0x80   : > { %v345_v1 = vld [vmem:[%s287_s28] sm:$0x7f]  ;;  %vm346_vm0 = vcmask 1046528   ;;  %v344_v8 = vld [vmem:[#allocation2] sm:$0x1] }
  0x81   : > { %v347_v2 = vsel %vm346_vm0, %v345_v1, 0.0 }
  0x82   : > { %v348_v3 = vrot.slane %v347_v2, 4 }
  0x84   : > { %v349_v4 = vadd.f32 %v348_v3, %v347_v2 }
  0x86   : > { %v350_v5 = vrot.slane %v349_v4, 2 }
  0x88   : > { %v351_v6 = vadd.f32 %v350_v5, %v349_v4 }
  0x8a   : > { %v352_v7 = vrot.slane %v351_v6, 1 }
  0x8c   : > { %v353_v9 = vadd.f32 %v352_v7, %v351_v6 }
  0x8e   : > { %v354_v10 = vadd.f32 %v353_v9, %v344_v8 }
  0x90   : > { %355 = vst [vmem:[#allocation2] sm:$0x1] %v354_v10 }
  0x91 PF: > { %p600_p9 = scmp.le.s32.totalorder %s339_s22, 7 }
  0x93   : > { %359 = sbr.rel (%p600_p9) target bundleno = 176 (0xb0), region = 72 }
  0x98   : > { %v360_v11 = vlaneseq  ;;  %v362_v12 = vstv %s338_s21  ;;  %v365_v15 = vld [vmem:[%s287_s28] sm:$0x7f]  ;;  %vm368_vm1 = vcmask 1046528   ;;  %v367_v23 = vld [vmem:[#allocation2] sm:$0x1] }
  0x9a   : > { %v361_v13 = vshrl.u32 %v360_v11, 7 }
  0x9c   : > { %v363_v14 = vadd.s32 %v362_v12, %v361_v13 }
  0x9e   : > { %vm364_vm2 = vcmp.lt.s32.totalorder %v363_v14, 7 }
  0x9f   : > { %v366_v16 = vsel %vm364_vm2, %v365_v15, 0.0 }
  0xa0   : > { %v369_v17 = vsel %vm368_vm1, %v366_v16, 0.0 }
  0xa1   : > { %v370_v18 = vrot.slane %v369_v17, 4 }
  0xa3   : > { %v371_v19 = vadd.f32 %v370_v18, %v369_v17 }
  0xa5   : > { %v372_v20 = vrot.slane %v371_v19, 2 }
  0xa7   : > { %v373_v21 = vadd.f32 %v372_v20, %v371_v19 }
  0xa9   : > { %v374_v22 = vrot.slane %v373_v21, 1 }
  0xab   : > { %v375_v24 = vadd.f32 %v374_v22, %v373_v21 }
  0xad   : > { %v376_v25 = vadd.f32 %v375_v24, %v367_v23 }
  0xaf   : > { %377 = vst [vmem:[#allocation2] sm:$0x1] %v376_v25 }
  0xb0 PF: > { %vm443_vm3 = vcmask 1040384   ;;  %s381_s9 = sld [smem:[#allocation9]]  ;;  %p454_p10 = scmp.eq.s32.totalorder %s926_s2, 0 }
  0xb1   : > { %s382_s8 = sld [smem:[#allocation10]] }
  0xb2   : > { %s384_s14 = sld [smem:[#allocation12]] }
  0xb3   : > { %s601_s15 = sld [smem:[#allocation9 + $0x1]] }
  0xb4   : > { %s602_s17 = sld [smem:[#allocation10 + $0x1]] }
  0xb5   : > { %s603_s18 = sld [smem:[#allocation12 + $0x1]] }
  0xb6   : > { %v442_v26 = vld [vmem:[#allocation2] sm:$0x1]  ;;  %s604_s20 = sld [smem:[#allocation9 + $0x2]] }
  0xb7   : > { %v444_v27 = vsel %vm443_vm3, %v442_v26, 0.0  ;;  %s605_s23 = sld [smem:[#allocation10 + $0x2]]  ;;  %s383_s28 = smul.f32 %s382_s8, %s381_s9 }
  0xb8   : > { %445 = vadd.xlane.f32.xlu0 %v444_v27  ;;  %s606_s24 = sld [smem:[#allocation12 + $0x2]] }
  0xb9   : > { %s607_s21 = sld [smem:[#allocation9 + $0x3]] }
  0xba   : > { %s387_s22 = smul.f32 %s602_s17, %s601_s15  ;;  %s608_s13 = sld [smem:[#allocation10 + $0x3]] }
  0xbb   : > { %s390_s7 = sadd.f32 %s603_s18, %s384_s14 }
  0xbc   : > { %s609_s0 = sld [smem:[#allocation12 + $0x3]] }
  0xbd   : > { %s388_s1 = sadd.f32 %s387_s22, %s383_s28  ;;  %s393_s3 = smul.f32 %s605_s23, %s604_s20 }
  0xbe   : > { %s396_s4 = sadd.f32 %s606_s24, %s390_s7 }
  0xbf   : > { %s610_s16 = sld [smem:[#allocation9 + $0x4]] }
  0xc0   : > { %s611_s30 = sld [smem:[#allocation10 + $0x4]]  ;;  %s399_s27 = smul.f32 %s608_s13, %s607_s21 }
  0xc1   : > { %s612_s29 = sld [smem:[#allocation12 + $0x4]] }
  0xc2   : > { %s394_s19 = sadd.f32 %s393_s3, %s388_s1 }
  0xc3   : > { %s402_s5 = sadd.f32 %s609_s0, %s396_s4 }
  0xc4   : > { %s613_s12 = sld [smem:[#allocation9 + $0x5]] }
  0xc5   : > { %s614_s25 = sld [smem:[#allocation10 + $0x5]] }
  0xc6   : > { %s615_s6 = sld [smem:[#allocation12 + $0x5]]  ;;  %s405_s11 = smul.f32 %s611_s30, %s610_s16 }
  0xc7   : > { %s400_s9 = sadd.f32 %s399_s27, %s394_s19 }
  0xc8   : > { %s616_s8 = sld [smem:[#allocation9 + $0x6]] }
  0xc9   : > { %s408_s15 = sadd.f32 %s612_s29, %s402_s5 }
  0xca   : > { %s617_s17 = sld [smem:[#allocation10 + $0x6]] }
  0xcb   : > { %s618_s14 = sld [smem:[#allocation12 + $0x6]]  ;;  %s411_s26 = smul.f32 %s614_s25, %s613_s12 }
  0xcc   : > { %s406_s18 = sadd.f32 %s405_s11, %s400_s9 }
  0xcd   : > { %s414_s28 = sadd.f32 %s615_s6, %s408_s15 }
  0xce   : > { %s619_s20 = sld [smem:[#allocation9 + $0x7]] }
  0xcf   : > { %s621_s7 = sld [smem:[#allocation12 + $0x7]] }
  0xd0   : > { %s620_s23 = sld [smem:[#allocation10 + $0x7]]  ;;  %s417_s22 = smul.f32 %s617_s17, %s616_s8 }
  0xd1   : > { %s412_s24 = sadd.f32 %s411_s26, %s406_s18 }
  0xd2   : > { %s420_s1 = sadd.f32 %s618_s14, %s414_s28 }
  0xd3   : > { %s622_s3 = sld [smem:[#allocation9 + $0x8]] }
  0xd4   : > { %s623_s0 = sld [smem:[#allocation10 + $0x8]] }
  0xd5   : > { %s624_s4 = sld [smem:[#allocation12 + $0x8]] }
  0xd6   : > { %s418_s13 = sadd.f32 %s417_s22, %s412_s24  ;;  %s423_s19 = smul.f32 %s620_s23, %s619_s20 }
  0xd7   : > { %s426_s27 = sadd.f32 %s621_s7, %s420_s1  ;;  %s629_s20 = sshll.u32 %s926_s2, 7 }
  0xd8   : > { %s625_s30 = sld [smem:[#allocation9 + $0x9]]  ;;  %s1258_s23 = scalar_lea.vmem [#allocation13], %s1138_s10 }
  0xd9   : > { %s626_s29 = sld [smem:[#allocation10 + $0x9]]  ;;  %s475_s24 = sshll.u32 %s1258_s23, 4  ;;  %s476_s24 = int_to_ptr.vmem [resolvable:$true] %s475_s24 }
  0xda   : > { %s627_s5 = sld [smem:[#allocation12 + $0x9]]  ;;  %s429_s6 = smul.f32 %s623_s0, %s622_s3 }
  0xdb   : > { %s424_s11 = sadd.f32 %s423_s19, %s418_s13  ;;  %s1260_s13 = smov %s1258_s23 }
  0xdc   : > { %s432_s25 = sadd.f32 %s624_s4, %s426_s27  ;;  %s941_s2 = smov [#allocation13]  }
  0xdd   : > { %s439_s12 = sld [smem:[#allocation3]] }
  0xde   : > { %s455_s16 = sld [smem:[#allocation4]] }
  0xdf   : > { %s430_s26 = sadd.f32 %s429_s6, %s424_s11  ;;  %s435_s21 = smul.f32 %s626_s29, %s625_s30 }
  0xe0   : > { %s1256_s9 = sld [smem:[#allocation19_spill]]  ;;  %s825_s30 = scalar_lea.vmem %s476_s24, 128 }
  0xe1   : > { %s438_s8 = sadd.f32 %s627_s5, %s432_s25  ;;  %p826_p6 = scmp.ne.s32.totalorder %s476_s24, %s825_s30 }
  0xe2   : > { %s436_s15 = sadd.f32 %s435_s21, %s430_s26  ;;  %s829_s29 = sshll.u32 %s941_s2, 4  ;;  %s830_s29 = int_to_ptr.vmem [resolvable:$false] %s829_s29 }
  0xe3   : > { %s1257_s17 = sld [smem:[#allocation24_spill]]  ;;  %s440_s14 = smul.f32 %s439_s12, %s438_s8 }
  0xe4   : > { %s1277_s16 = smov (!%p454_p10, %s455_s16), 0.0  ;;  %s1259_s0 = sld [smem:[#allocation32_spill]] }
  0xe5   : > { %s441_s18 = sadd.f32 %s440_s14, %s436_s15  ;;  %s831_s5 = scalar_lea.vmem %s830_s29, 256 }
  0xe6   : > { %s1261_s27 = sand.u32 1, %s1256_s9   ;;  %p832_p11 = scmp.lt.s32.totalorder %s476_s24, %s830_s29 }
  0xe7   : > { %s462_s19 = scalar_lea.sflag [#allocation7], %s1261_s27  ;;  %p833_p3 = scmp.lt.s32.totalorder %s831_s5, %s825_s30 }
  0xe9   : > { %p1262_p12 = scmp.ne.s32.totalorder %s1257_s17, 0  ;;  %p834_p2 = por %p833_p3, %p832_p11 }
  0xea   : > { %s1152_s4 = scalar_lea.hbm %s1259_s0, %s629_s20 }
  0xeb   : > { %p827_p1 = pnand %p826_p6, %p1262_p12 }
  0xed   : > { %p828_p4 = pneg %p827_p1 }
  0xef   : > { %p835_p5 = pnand %p834_p2, %p828_p4 }
 0x141   : > { %v446_v28 = vpop.xlane.xlu0 %445 }
 0x142   : > { %v447_v29 = vrot.slane %v446_v28, 4 }
 0x144   : > { %v448_v30 = vadd.f32 %v447_v29, %v446_v28 }
 0x146   : > { %v449_v31 = vrot.slane %v448_v30, 2 }
 0x148   : > { %v450_v32 = vadd.f32 %v449_v31, %v448_v30 }
 0x14a   : > { %v451_v33 = vrot.slane %v450_v32, 1 }
 0x14c   : > { %v452_v34 = vadd.f32 %v451_v33, %v450_v32 }
 0x14e   : > { %632 = vpush %v452_v34 }
 0x17f   : > { %s633_s28 = spop %632 }
 0x180   : > { %s457_s7 = sadd.f32 %s633_s28, %s1277_s16 }
 0x182   : > { %s458_s22 = smul.f32 %s457_s7, %s441_s18 }
 0x184   : > { %v459_v35 = vstv %s458_s22 }
 0x185   : > { %460 = vst [vmem:[%s1260_s13] sm:$0xff] %v459_v35 }
 0x186   : > { %838 = shalt.err (!%p835_p5)
}
 0x187   : > { %s839_s10 = scalar_lea.hbm %s1152_s4, 128  ;;  %s843_s25 = scalar_lea.hbm %s1259_s0, 256 }
 0x188   : > { %p840_p0 = scmp.ne.s32.totalorder %s1152_s4, %s839_s10  ;;  %p844_p13 = scmp.lt.s32.totalorder %s1152_s4, %s1259_s0 }
 0x189   : > { %p845_p9 = scmp.lt.s32.totalorder %s843_s25, %s839_s10 }
 0x18a   : > { %p841_p7 = pnand %p840_p0, %p1262_p12 }
 0x18b   : > { %p846_p10 = por %p845_p9, %p844_p13 }
 0x18c   : > { %p842_p8 = pneg %p841_p7 }
 0x18e   : > { %p847_p6 = pnand %p846_p10, %p842_p8 }
 0x190   : > { %850 = shalt.err (!%p847_p6)
}
 0x191   : > { %648 = dma.vmem_to_hbm [thread:$0]  (%p1262_p12), %s476_s24, 128, %s1152_s4, %s462_s19  }
 0x192 PF: > { %s1263_s26 = sld [smem:[#allocation18_spill]] }
 0x193   : > { %s1264_s21 = sld [smem:[#allocation25_spill]] }
 0x194   : > { %s1265_s9 = sld [smem:[#allocation23_spill]] }
 0x198   : > { %s487_s8 = sand.u32 1, %s1263_s26  }
 0x199   : > { %p1266_p1 = scmp.ne.s32.totalorder %s1264_s21, 0  ;;  %s488_s15 = scalar_lea.sflag [#allocation7], %s487_s8 }
 0x19a   : > { %p1267_p4 = scmp.ge.s32.totalorder %s1265_s9, 2 }
 0x19c   : > { %p665_p11 = pnand %p1267_p4, %p1266_p1 }
 0x19e   : > { %p666_p3 = pneg %p665_p11 }
 0x1a0   : > { %900 = dma.done.wait (%p666_p3), %s488_s15, 128  }
 0x1a1   : > { %902 = vsyncadd (%p666_p3), %s488_s15, 4294967168  ;;  %s26_s5 = sadd.s32 1, %s1265_s9   ;;  %s1268_s25 = sld [smem:[#allocation19_spill]] }
 0x1a2   : > { %p23_p2 = scmp.ge.s32.totalorder %s26_s5, 4   ;;  %s1269_s26 = sld [smem:[#allocation20_spill]] }
 0x1a3   : > { %s1270_s27 = sld [smem:[#allocation27_spill]]  ;;  %s1192_s29 = smov 0  }
 0x1a4   : > { %s1271_s28 = sld [smem:[#allocation21_spill]]  ;;  %25 = sbr.rel (!%p23_p2) target bundleno = 17 (0x11), region = 118 }
 0x1a5   : > { %s1272_s2 = sld [smem:[#allocation22_spill]] }
 0x1a6   : > { %s1273_s30 = sld [smem:[#allocation26_spill]] }
 0x1a9   :  { %493 = vsyncpa [#allocation6], 1 }
 0x1aa   :  { %495 = vsyncpa [#allocation6 + $0x1], 1 }
 0x1ab   :  { %496 = vsyncpa [#allocation7], 1 }
 0x1ac   :  { %498 = vsyncpa [#allocation7 + $0x1], 1 }
 0x1ad   :  { %499 = vsyncpa [#allocation8], 1 }
 0x1ae   :  { %501 = vsyncpa [#allocation8 + $0x1], 1 }
 0x1af   :  { %502 = vsyncpa [#allocation11], 1 }

</bundles_post_ra>
